<compile_context>
chip_gen: v7x
topology: tpu7x:2x2x1
jax: 0.10.0
libtpu: 0.0.40
codegen_flags: <defaults>
</compile_context>

<pallas_src>
import itertools

import numpy as np
import jax
import jax.numpy as jnp
from jax.experimental import pallas as pl
from jax.experimental.pallas import tpu as pltpu

try:  # host-side Hungarian solver (optional)
    from scipy.optimize import linear_sum_assignment as _scipy_lsa
except Exception:  # pragma: no cover
    _scipy_lsa = None

# __init__ hyper-parameters (cost weights), initialized deterministically in-script.
COST_CLASS = 1.0
COST_BBOX = 1.0
COST_GIOU = 1.0
assert COST_CLASS != 0 or COST_BBOX != 0 or COST_GIOU != 0, "all cost can't be 0"

_DUMMY_BOX = (0.5, 0.5, 1.0, 1.0)  # non-degenerate pad box: area 1, never divides by 0


def _round_up(x, m):
    return ((x + m - 1) // m) * m


def _scale(w, x):
    # weights are Python floats; skip the multiply entirely when it is the identity
    return x if w == 1.0 else w * x


def _cost_matrix_kernel(logits_ref, pgeo_ref, onehot_ref, tgeo_ref, c_ref):
    # ---- softmax over (padded) classes: VPU + EUP ------------------------------------
    logits = logits_ref[...]                                        # [TN, NCp]
    e = jnp.exp(logits - jnp.max(logits, axis=-1, keepdims=True))
    probs = e * (1.0 / jnp.sum(e, axis=-1, keepdims=True))          # [TN, NCp]

    # ---- cost_class = -out_prob[:, tgt_ids] as one-hot matmul (exact gather, MXU) ----
    acc = _scale(-COST_CLASS,
                 jnp.dot(probs, onehot_ref[...],
                         preferred_element_type=jnp.float32))       # [TN, Mp]

    pg = pgeo_ref[...]   # [TN, 16] cols: cx, cy, w, h, x0, y0, x1, y1, area, 0...
    tg = tgeo_ref[...]   # [16, Mp] rows: cx, cy, w, h, x0, y0, x1, y1, area, 0...

    # ---- cost_bbox = L1 cdist, accumulated one coordinate at a time ------------------
    l1 = jnp.abs(pg[:, 0:1] - tg[0:1, :])
    for d in range(1, 4):  # static unroll over the 4 box coords
        l1 = l1 + jnp.abs(pg[:, d:d + 1] - tg[d:d + 1, :])
    acc = acc + _scale(COST_BBOX, l1)

    # ---- cost_giou = -GIoU, folded:  -giou = 1 - inter/union - union/earea ----------
    ox0, oy0, ox1, oy1, oar = (pg[:, 4:5], pg[:, 5:6], pg[:, 6:7], pg[:, 7:8], pg[:, 8:9])
    tx0, ty0, tx1, ty1, tar = (tg[4:5, :], tg[5:6, :], tg[6:7, :], tg[7:8, :], tg[8:9, :])

    iw = jnp.maximum(jnp.minimum(ox1, tx1) - jnp.maximum(ox0, tx0), 0.0)
    ih = jnp.maximum(jnp.minimum(oy1, ty1) - jnp.maximum(oy0, ty0), 0.0)
    inter = iw * ih                                                  # [TN, Mp]
    union = (oar + tar) - inter                                      # [TN, Mp]
    acc = acc + _scale(COST_GIOU,
                       1.0 - inter * pl.reciprocal(union, approx=True))

    ew = jnp.maximum(ox1, tx1) - jnp.minimum(ox0, tx0)
    eh = jnp.maximum(oy1, ty1) - jnp.minimum(oy0, ty0)
    earea = ew * eh                                                  # [TN, Mp]
    acc = acc - _scale(COST_GIOU,
                       union * pl.reciprocal(earea, approx=True))

    c_ref[...] = acc


def _geom_features(boxes):
    """[K, 4] cxcywh -> [K, 16] = (cx, cy, w, h, x0, y0, x1, y1, area, 0*7)."""
    cx, cy, w, h = boxes[:, 0], boxes[:, 1], boxes[:, 2], boxes[:, 3]
    x0, y0 = cx - 0.5 * w, cy - 0.5 * h
    x1, y1 = cx + 0.5 * w, cy + 0.5 * h
    area = (x1 - x0) * (y1 - y0)
    feat = jnp.stack([cx, cy, w, h, x0, y0, x1, y1, area], axis=-1)
    return jnp.pad(feat, ((0, 0), (0, 16 - feat.shape[-1])))


def compute_cost_matrix(pred_logits, pred_boxes, tgt_ids, tgt_boxes, *, tile_n=512):
    """Returns C of shape [bs, num_queries, total_num_targets], float32."""
    bs, nq, nc = pred_logits.shape
    N = bs * nq
    M = int(tgt_ids.shape[0])

    # ---- padded sizes: lane-dense last dims, sublane-aligned row tiles ----------------
    nc_pad = _round_up(nc, 128)
    m_pad = _round_up(max(M, 1), 128)
    tile_n = max(8, min(_round_up(tile_n, 8), _round_up(N, 8)))
    n_pad = _round_up(N, tile_n)
    grid_n = n_pad // tile_n

    # ---- wrapper-side padding / precompute (pure layout plumbing) ---------------------
    logits = pred_logits.reshape(N, nc).astype(jnp.float32)
    logits = jnp.pad(logits, ((0, 0), (0, nc_pad - nc)), constant_values=-1e30)
    logits = jnp.pad(logits, ((0, n_pad - N), (0, 0)))                 # [n_pad, nc_pad]

    dummy_rows = jnp.tile(jnp.array(_DUMMY_BOX, jnp.float32)[None, :], (n_pad - N, 1))
    oboxes = jnp.concatenate(
        [pred_boxes.reshape(N, 4).astype(jnp.float32), dummy_rows], axis=0)
    pgeo = _geom_features(oboxes)                                      # [n_pad, 16]

    dummy_cols = jnp.tile(jnp.array(_DUMMY_BOX, jnp.float32)[None, :], (m_pad - M, 1))
    tboxes = jnp.concatenate([tgt_boxes.astype(jnp.float32), dummy_cols], axis=0)
    tgeo = _geom_features(tboxes).T                                    # [16, m_pad]

    onehot = jax.nn.one_hot(tgt_ids, nc, dtype=jnp.float32).T          # [nc, M]
    onehot = jnp.pad(onehot, ((0, nc_pad - nc), (0, m_pad - M)))       # [nc_pad, m_pad]

    # ---- VMEM budget: double-buffered row tiles + resident target-side slabs ----------
    per_step = 4 * tile_n * (nc_pad + 16 + m_pad)
    resident = 4 * (nc_pad + 16) * m_pad
    vmem_bytes = int(min(max(2 * (per_step + resident) + (4 << 20), 32 << 20), 48 << 20))

    c = pl.pallas_call(
        _cost_matrix_kernel,
        out_shape=jax.ShapeDtypeStruct((n_pad, m_pad), jnp.float32),
        grid=(grid_n,),
        in_specs=[
            pl.BlockSpec((tile_n, nc_pad), lambda i: (i, 0)),
            pl.BlockSpec((tile_n, 16), lambda i: (i, 0)),
            pl.BlockSpec((nc_pad, m_pad), lambda i: (0, 0)),   # resident across steps
            pl.BlockSpec((16, m_pad), lambda i: (0, 0)),       # resident across steps
        ],
        out_specs=pl.BlockSpec((tile_n, m_pad), lambda i: (i, 0)),
        compiler_params=pltpu.CompilerParams(
            dimension_semantics=("parallel",),   # shards row tiles across TCs on v7x
            vmem_limit_bytes=vmem_bytes),
    )(logits, pgeo, onehot, tgeo)

    return c[:N, :M].reshape(bs, nq, M)


def _linear_sum_assignment(cost):
    """Minimal-cost assignment (cols <= rows): scipy if present, else exact brute force."""
    if _scipy_lsa is not None:
        rows, cols = _scipy_lsa(cost)
        return np.asarray(rows, dtype=np.int64), np.asarray(cols, dtype=np.int64)
    # TODO(synk): the Hungarian algorithm is sequential / data-dependent; without scipy it
    # is solved exhaustively here, which is only viable for tiny (toy) problem sizes.
    n_rows, n_cols = cost.shape
    best_val, best_perm = None, None
    col_idx = np.arange(n_cols)
    for perm in itertools.permutations(range(n_rows), n_cols):
        val = cost[list(perm), col_idx].sum()
        if best_val is None or val < best_val:
            best_val, best_perm = val, perm
    pairs = sorted(zip(best_perm, range(n_cols)))
    rows = np.array([p[0] for p in pairs], dtype=np.int64)
    cols = np.array([p[1] for p in pairs], dtype=np.int64)
    return rows, cols


def hungarian_matcher(outputs, targets):
    """Mirrors HungarianMatcher.forward (cost matrix computed in the Pallas kernel)."""
    tgt_ids = jnp.concatenate([t["labels"] for t in targets])
    tgt_boxes = jnp.concatenate([t["boxes"] for t in targets])

    C = compute_cost_matrix(outputs["pred_logits"], outputs["pred_boxes"],
                            tgt_ids, tgt_boxes)
    C = jax.block_until_ready(C)
    C_np = np.asarray(C)

    sizes = [int(t["boxes"].shape[0]) for t in targets]
    splits = np.cumsum(sizes)[:-1]
    chunks = np.split(C_np, splits, axis=-1)

    indices = []
    for i, c in enumerate(chunks):
        rows, cols = _linear_sum_assignment(c[i])
        indices.append((rows, cols))
    return indices


def _reference_cost(pred_logits, pred_boxes, tgt_ids, tgt_boxes):
    """Pure-numpy reference of the DETR matching cost matrix."""
    bs, nq, _ = pred_logits.shape
    logits = np.asarray(pred_logits, dtype=np.float64).reshape(bs * nq, -1)
    probs = np.exp(logits - logits.max(-1, keepdims=True))
    probs = probs / probs.sum(-1, keepdims=True)
    ob = np.asarray(pred_boxes, dtype=np.float64).reshape(bs * nq, 4)
    tb = np.asarray(tgt_boxes, dtype=np.float64)
    ids = np.asarray(tgt_ids)

    cost_class = -probs[:, ids]
    cost_bbox = np.abs(ob[:, None, :] - tb[None, :, :]).sum(-1)

    def xyxy(b):
        return np.stack([b[:, 0] - 0.5 * b[:, 2], b[:, 1] - 0.5 * b[:, 3],
                         b[:, 0] + 0.5 * b[:, 2], b[:, 1] + 0.5 * b[:, 3]], -1)

    b1, b2 = xyxy(ob), xyxy(tb)
    area1 = (b1[:, 2] - b1[:, 0]) * (b1[:, 3] - b1[:, 1])
    area2 = (b2[:, 2] - b2[:, 0]) * (b2[:, 3] - b2[:, 1])
    lt = np.maximum(b1[:, None, :2], b2[None, :, :2])
    rb = np.minimum(b1[:, None, 2:], b2[None, :, 2:])
    wh = np.clip(rb - lt, 0, None)
    inter = wh[..., 0] * wh[..., 1]
    union = area1[:, None] + area2[None, :] - inter
    iou = inter / union
    lt2 = np.minimum(b1[:, None, :2], b2[None, :, :2])
    rb2 = np.maximum(b1[:, None, 2:], b2[None, :, 2:])
    wh2 = np.clip(rb2 - lt2, 0, None)
    enc = wh2[..., 0] * wh2[..., 1]
    giou = iou - (enc - union) / enc

    C = COST_BBOX * cost_bbox + COST_CLASS * cost_class + COST_GIOU * (-giou)
    return C.reshape(bs, nq, -1)


if __name__ == "__main__":
    key = jax.random.PRNGKey(0)
    bs, nq, nc = 2, 8, 32
    sizes = [3, 5]  # num GT boxes per image

    k_logits, k_pbox, kt0, kt1, kl0, kl1 = jax.random.split(key, 6)

    def rand_boxes(k, n):
        kc, ks = jax.random.split(k)
        centers = jax.random.uniform(kc, (n, 2), minval=0.3, maxval=0.7)
        whs = jax.random.uniform(ks, (n, 2), minval=0.1, maxval=0.3)
        return jnp.concatenate([centers, whs], axis=-1).astype(jnp.float32)

    pred_logits = jax.random.normal(k_logits, (bs, nq, nc), dtype=jnp.float32)
    pred_boxes = rand_boxes(k_pbox, bs * nq).reshape(bs, nq, 4)

    targets = []
    for s, kb, kl in zip(sizes, (kt0, kt1), (kl0, kl1)):
        targets.append({
            "labels": jax.random.randint(kl, (s,), 0, nc),
            "boxes": rand_boxes(kb, s),
        })

    outputs = {"pred_logits": pred_logits, "pred_boxes": pred_boxes}

    # Run the Pallas cost-matrix kernel and check against the numpy reference.
    # Tolerance is relaxed vs. an exact-division kernel because the GIoU terms use the
    # EUP approximate reciprocal (pl.reciprocal(approx=True)); set approx=False in the
    # kernel to recover ~1e-4 agreement.
    tgt_ids = jnp.concatenate([t["labels"] for t in targets])
    tgt_boxes = jnp.concatenate([t["boxes"] for t in targets])
    C_kernel = jax.block_until_ready(
        compute_cost_matrix(pred_logits, pred_boxes, tgt_ids, tgt_boxes))
    C_ref = _reference_cost(pred_logits, pred_boxes, tgt_ids, tgt_boxes)
    assert np.allclose(np.asarray(C_kernel), C_ref, rtol=1e-3, atol=1e-2), \
        "cost matrix mismatch"

    # Full forward semantics: per-image Hungarian matching on the kernel's cost matrix.
    indices = hungarian_matcher(outputs, targets)
    for (ri, ci), s in zip(indices, sizes):
        assert len(ri) == len(ci) == min(nq, s)
        assert ri.dtype == np.int64 and ci.dtype == np.int64

    print("KERNEL_OK")
</pallas_src>

<mosaic_0001>
module attributes {stable_mosaic.version = 11 : i64} {
  func.func @_cost_matrix_kernel(%arg0: i32, %arg1: memref<16x128xf32, #tpu.memory_space<vmem>>, %arg2: memref<16x16xf32, #tpu.memory_space<vmem>>, %arg3: memref<128x128xf32, #tpu.memory_space<vmem>>, %arg4: memref<16x128xf32, #tpu.memory_space<vmem>>, %arg5: memref<16x128xf32, #tpu.memory_space<vmem>>) attributes {dimension_semantics = [#tpu.dimension_semantics<parallel>], iteration_bounds = array<i64: 1>, scalar_prefetch = 0 : i64, scratch_operands = 0 : i64, tpu.core_type = #tpu.core_type<tc>, window_params = [{transform_indices = @transform_0, window_bounds = array<i64: 16, 128>}, {transform_indices = @transform_1, window_bounds = array<i64: 16, 16>}, {pipeline_mode = #tpu.pipeline_mode<synchronous>, transform_indices = @transform_2, window_bounds = array<i64: 128, 128>}, {pipeline_mode = #tpu.pipeline_mode<synchronous>, transform_indices = @transform_3, window_bounds = array<i64: 16, 128>}, {transform_indices = @transform_4, window_bounds = array<i64: 16, 128>}]} {
    %c0 = arith.constant 0 : index
    %c0_0 = arith.constant 0 : index
    %0 = vector.load %arg1[%c0, %c0_0] : memref<16x128xf32, #tpu.memory_space<vmem>>, vector<16x128xf32>
    %cst = arith.constant dense<0xFF800000> : vector<16xf32>
    %1 = vector.multi_reduction <maximumf>, %0, %cst [1] : vector<16x128xf32> to vector<16xf32>
    %2 = vector.shape_cast %1 : vector<16xf32> to vector<16x1xf32>
    %3 = vector.broadcast %2 : vector<16x1xf32> to vector<16x128xf32>
    %4 = arith.subf %0, %3 : vector<16x128xf32>
    %5 = math.exp %4 : vector<16x128xf32>
    %cst_1 = arith.constant dense<0.000000e+00> : vector<16xf32>
    %6 = vector.multi_reduction <add>, %5, %cst_1 [1] : vector<16x128xf32> to vector<16xf32>
    %7 = vector.shape_cast %6 : vector<16xf32> to vector<16x1xf32>
    %cst_2 = arith.constant 1.000000e+00 : f32
    %8 = vector.broadcast %cst_2 : f32 to vector<16x1xf32>
    %9 = arith.divf %8, %7 : vector<16x1xf32>
    %10 = vector.broadcast %9 : vector<16x1xf32> to vector<16x128xf32>
    %11 = arith.mulf %5, %10 : vector<16x128xf32>
    %c0_3 = arith.constant 0 : index
    %c0_4 = arith.constant 0 : index
    %12 = vector.load %arg3[%c0_3, %c0_4] : memref<128x128xf32, #tpu.memory_space<vmem>>, vector<128x128xf32>
    %cst_5 = arith.constant dense<0.000000e+00> : vector<16x128xf32>
    %13 = tpu.matmul %11, %12, %cst_5 {dimension_numbers = #tpu.dot_dimension_numbers<[1], [0], [0], [1], [0, 0, 1, 1], [], []>} : vector<16x128xf32>, vector<128x128xf32>, vector<16x128xf32> -> vector<16x128xf32>
    %cst_6 = arith.constant -1.000000e+00 : f32
    %14 = vector.broadcast %cst_6 : f32 to vector<16x128xf32>
    %15 = arith.mulf %14, %13 : vector<16x128xf32>
    %c0_7 = arith.constant 0 : index
    %c0_8 = arith.constant 0 : index
    %16 = vector.load %arg2[%c0_7, %c0_8] : memref<16x16xf32, #tpu.memory_space<vmem>>, vector<16x16xf32>
    %c0_9 = arith.constant 0 : index
    %c0_10 = arith.constant 0 : index
    %17 = vector.load %arg4[%c0_9, %c0_10] : memref<16x128xf32, #tpu.memory_space<vmem>>, vector<16x128xf32>
    %18 = vector.extract_strided_slice %16 {offsets = [0, 0], sizes = [16, 1], strides = [1, 1]} : vector<16x16xf32> to vector<16x1xf32>
    %19 = vector.extract_strided_slice %17 {offsets = [0, 0], sizes = [1, 128], strides = [1, 1]} : vector<16x128xf32> to vector<1x128xf32>
    %20 = vector.broadcast %18 : vector<16x1xf32> to vector<16x128xf32>
    %21 = vector.broadcast %19 : vector<1x128xf32> to vector<16x128xf32>
    %22 = arith.subf %20, %21 : vector<16x128xf32>
    %23 = math.absf %22 : vector<16x128xf32>
    %24 = vector.extract_strided_slice %16 {offsets = [0, 1], sizes = [16, 1], strides = [1, 1]} : vector<16x16xf32> to vector<16x1xf32>
    %25 = vector.extract_strided_slice %17 {offsets = [1, 0], sizes = [1, 128], strides = [1, 1]} : vector<16x128xf32> to vector<1x128xf32>
    %26 = vector.broadcast %24 : vector<16x1xf32> to vector<16x128xf32>
    %27 = vector.broadcast %25 : vector<1x128xf32> to vector<16x128xf32>
    %28 = arith.subf %26, %27 : vector<16x128xf32>
    %29 = math.absf %28 : vector<16x128xf32>
    %30 = arith.addf %23, %29 : vector<16x128xf32>
    %31 = vector.extract_strided_slice %16 {offsets = [0, 2], sizes = [16, 1], strides = [1, 1]} : vector<16x16xf32> to vector<16x1xf32>
    %32 = vector.extract_strided_slice %17 {offsets = [2, 0], sizes = [1, 128], strides = [1, 1]} : vector<16x128xf32> to vector<1x128xf32>
    %33 = vector.broadcast %31 : vector<16x1xf32> to vector<16x128xf32>
    %34 = vector.broadcast %32 : vector<1x128xf32> to vector<16x128xf32>
    %35 = arith.subf %33, %34 : vector<16x128xf32>
    %36 = math.absf %35 : vector<16x128xf32>
    %37 = arith.addf %30, %36 : vector<16x128xf32>
    %38 = vector.extract_strided_slice %16 {offsets = [0, 3], sizes = [16, 1], strides = [1, 1]} : vector<16x16xf32> to vector<16x1xf32>
    %39 = vector.extract_strided_slice %17 {offsets = [3, 0], sizes = [1, 128], strides = [1, 1]} : vector<16x128xf32> to vector<1x128xf32>
    %40 = vector.broadcast %38 : vector<16x1xf32> to vector<16x128xf32>
    %41 = vector.broadcast %39 : vector<1x128xf32> to vector<16x128xf32>
    %42 = arith.subf %40, %41 : vector<16x128xf32>
    %43 = math.absf %42 : vector<16x128xf32>
    %44 = arith.addf %37, %43 : vector<16x128xf32>
    %45 = arith.addf %15, %44 : vector<16x128xf32>
    %46 = vector.extract_strided_slice %16 {offsets = [0, 4], sizes = [16, 1], strides = [1, 1]} : vector<16x16xf32> to vector<16x1xf32>
    %47 = vector.extract_strided_slice %16 {offsets = [0, 5], sizes = [16, 1], strides = [1, 1]} : vector<16x16xf32> to vector<16x1xf32>
    %48 = vector.extract_strided_slice %16 {offsets = [0, 6], sizes = [16, 1], strides = [1, 1]} : vector<16x16xf32> to vector<16x1xf32>
    %49 = vector.extract_strided_slice %16 {offsets = [0, 7], sizes = [16, 1], strides = [1, 1]} : vector<16x16xf32> to vector<16x1xf32>
    %50 = vector.extract_strided_slice %16 {offsets = [0, 8], sizes = [16, 1], strides = [1, 1]} : vector<16x16xf32> to vector<16x1xf32>
    %51 = vector.extract_strided_slice %17 {offsets = [4, 0], sizes = [1, 128], strides = [1, 1]} : vector<16x128xf32> to vector<1x128xf32>
    %52 = vector.extract_strided_slice %17 {offsets = [5, 0], sizes = [1, 128], strides = [1, 1]} : vector<16x128xf32> to vector<1x128xf32>
    %53 = vector.extract_strided_slice %17 {offsets = [6, 0], sizes = [1, 128], strides = [1, 1]} : vector<16x128xf32> to vector<1x128xf32>
    %54 = vector.extract_strided_slice %17 {offsets = [7, 0], sizes = [1, 128], strides = [1, 1]} : vector<16x128xf32> to vector<1x128xf32>
    %55 = vector.extract_strided_slice %17 {offsets = [8, 0], sizes = [1, 128], strides = [1, 1]} : vector<16x128xf32> to vector<1x128xf32>
    %56 = vector.broadcast %48 : vector<16x1xf32> to vector<16x128xf32>
    %57 = vector.broadcast %53 : vector<1x128xf32> to vector<16x128xf32>
    %58 = arith.minimumf %56, %57 : vector<16x128xf32>
    %59 = vector.broadcast %46 : vector<16x1xf32> to vector<16x128xf32>
    %60 = vector.broadcast %51 : vector<1x128xf32> to vector<16x128xf32>
    %61 = arith.maximumf %59, %60 : vector<16x128xf32>
    %62 = arith.subf %58, %61 : vector<16x128xf32>
    %cst_11 = arith.constant 0.000000e+00 : f32
    %63 = vector.broadcast %cst_11 : f32 to vector<16x128xf32>
    %64 = arith.maximumf %62, %63 : vector<16x128xf32>
    %65 = vector.broadcast %49 : vector<16x1xf32> to vector<16x128xf32>
    %66 = vector.broadcast %54 : vector<1x128xf32> to vector<16x128xf32>
    %67 = arith.minimumf %65, %66 : vector<16x128xf32>
    %68 = vector.broadcast %47 : vector<16x1xf32> to vector<16x128xf32>
    %69 = vector.broadcast %52 : vector<1x128xf32> to vector<16x128xf32>
    %70 = arith.maximumf %68, %69 : vector<16x128xf32>
    %71 = arith.subf %67, %70 : vector<16x128xf32>
    %cst_12 = arith.constant 0.000000e+00 : f32
    %72 = vector.broadcast %cst_12 : f32 to vector<16x128xf32>
    %73 = arith.maximumf %71, %72 : vector<16x128xf32>
    %74 = arith.mulf %64, %73 : vector<16x128xf32>
    %75 = vector.broadcast %50 : vector<16x1xf32> to vector<16x128xf32>
    %76 = vector.broadcast %55 : vector<1x128xf32> to vector<16x128xf32>
    %77 = arith.addf %75, %76 : vector<16x128xf32>
    %78 = arith.subf %77, %74 : vector<16x128xf32>
    %79 = tpu.reciprocal %78 {approx = true} : vector<16x128xf32> -> vector<16x128xf32>
    %80 = arith.mulf %74, %79 : vector<16x128xf32>
    %cst_13 = arith.constant 1.000000e+00 : f32
    %81 = vector.broadcast %cst_13 : f32 to vector<16x128xf32>
    %82 = arith.subf %81, %80 : vector<16x128xf32>
    %83 = arith.addf %45, %82 : vector<16x128xf32>
    %84 = vector.broadcast %48 : vector<16x1xf32> to vector<16x128xf32>
    %85 = vector.broadcast %53 : vector<1x128xf32> to vector<16x128xf32>
    %86 = arith.maximumf %84, %85 : vector<16x128xf32>
    %87 = vector.broadcast %46 : vector<16x1xf32> to vector<16x128xf32>
    %88 = vector.broadcast %51 : vector<1x128xf32> to vector<16x128xf32>
    %89 = arith.minimumf %87, %88 : vector<16x128xf32>
    %90 = arith.subf %86, %89 : vector<16x128xf32>
    %91 = vector.broadcast %49 : vector<16x1xf32> to vector<16x128xf32>
    %92 = vector.broadcast %54 : vector<1x128xf32> to vector<16x128xf32>
    %93 = arith.maximumf %91, %92 : vector<16x128xf32>
    %94 = vector.broadcast %47 : vector<16x1xf32> to vector<16x128xf32>
    %95 = vector.broadcast %52 : vector<1x128xf32> to vector<16x128xf32>
    %96 = arith.minimumf %94, %95 : vector<16x128xf32>
    %97 = arith.subf %93, %96 : vector<16x128xf32>
    %98 = arith.mulf %90, %97 : vector<16x128xf32>
    %99 = tpu.reciprocal %98 {approx = true} : vector<16x128xf32> -> vector<16x128xf32>
    %100 = arith.mulf %78, %99 : vector<16x128xf32>
    %101 = arith.subf %83, %100 : vector<16x128xf32>
    %c0_14 = arith.constant 0 : index
    %c0_15 = arith.constant 0 : index
    %102 = vector.load %arg5[%c0_14, %c0_15] : memref<16x128xf32, #tpu.memory_space<vmem>>, vector<16x128xf32>
    tpu.vector_store %arg5[%c0_14, %c0_15], %101 {strides = array<i32>} : memref<16x128xf32, #tpu.memory_space<vmem>>, vector<16x128xf32>,
    return
  }
  func.func @transform_0(%arg0: i32) -> (i32, i32) {
    %c0_i32 = arith.constant 0 : i32
    %c0_i32_0 = arith.constant 0 : i32
    return %arg0, %c0_i32 : i32, i32
  }
  func.func @transform_1(%arg0: i32) -> (i32, i32) {
    %c0_i32 = arith.constant 0 : i32
    %c0_i32_0 = arith.constant 0 : i32
    return %arg0, %c0_i32 : i32, i32
  }
  func.func @transform_2(%arg0: i32) -> (i32, i32) {
    %c0_i32 = arith.constant 0 : i32
    %c0_i32_0 = arith.constant 0 : i32
    %c0_i32_1 = arith.constant 0 : i32
    return %c0_i32, %c0_i32_0 : i32, i32
  }
  func.func @transform_3(%arg0: i32) -> (i32, i32) {
    %c0_i32 = arith.constant 0 : i32
    %c0_i32_0 = arith.constant 0 : i32
    %c0_i32_1 = arith.constant 0 : i32
    return %c0_i32, %c0_i32_0 : i32, i32
  }
  func.func @transform_4(%arg0: i32) -> (i32, i32) {
    %c0_i32 = arith.constant 0 : i32
    %c0_i32_0 = arith.constant 0 : i32
    return %arg0, %c0_i32 : i32, i32
  }
}

</mosaic_0001>

<bundles_post_ra>
// kernel: tpu_custom_call.1
= control target key start
LH: loop header
LB: loop body
LE: loop exit
PB: predicated region body
PF: predicated region fallthrough
CT: control target
= control target key end

     0   :  { %9 = vsyncpa [#allocation3], 0  ;;  %s823_s0 = inlined_call_operand.hbm [shape: f32[16,128], index: 0, kind: input, shape index: {}]   ;;  %s824_s1 = inlined_call_operand.hbm [shape: f32[16,16], index: 1, kind: input, shape index: {}]   ;;  %s825_s2 = inlined_call_operand.hbm [shape: f32[128,128], index: 2, kind: input, shape index: {}]   ;;  %s826_s3 = inlined_call_operand.hbm [shape: f32[16,128], index: 3, kind: input, shape index: {}]   ;;  %s827_s4 = inlined_call_operand.hbm [shape: f32[16,128], index: 4, kind: output, shape index: {}]  }
   0x1   :  { %10 = vsyncpa [#allocation6], 0 }
   0x2   :  { %11 = vsyncpa [#allocation9], 0 }
   0x3   :  { %12 = vsyncpa [#allocation4], 0  ;;  %s646_s15 = smov [#allocation5]   ;;  %s647_s17 = smov [#allocation2]  }
   0x4   :  { %s30_s16 = sshll.u32 %s646_s15, 4  ;;  %s18_s18 = sshll.u32 %s647_s17, 4  ;;  %s31_s16 = int_to_ptr.vmem [resolvable:$true] %s30_s16  ;;  %s687_s18 = int_to_ptr.vmem [resolvable:$true] %s18_s18 }
   0x5   :  { %s528_s21 = scalar_lea.hbm %s824_s1, 256 }
   0x6   :  { %p529_p0 = scmp.ne.s32.totalorder %s824_s1, %s528_s21  ;;  %p532_p1 = scmp.lt.u32.totalorder %s528_s21, %s824_s1 }
   0x8   :  { %p534_p2 = pnand %p532_p1, %p529_p0 }
   0xa   :  { %537 = shalt.err (!%p534_p2)
}
   0xb   :  { %s538_s26 = scalar_lea.vmem %s31_s16, 256  ;;  %p543_p4 = scmp.lt.s32.totalorder %s31_s16, %s31_s16 }
   0xc   :  { %p539_p3 = scmp.ne.s32.totalorder %s31_s16, %s538_s26  ;;  %p544_p5 = scmp.lt.s32.totalorder %s538_s26, %s538_s26 }
   0xe   :  { %p545_p6 = por %p544_p5, %p543_p4 }
  0x10   :  { %p546_p7 = pnand %p545_p6, %p539_p3 }
  0x12   :  { %549 = shalt.err (!%p546_p7)
}
  0x13   :  { %s648_s27 = smov 128   ;;  %s649_s28 = smov 8  }
  0x14   :  { %36 = dma.hbm_to_vmem [thread:$0]  %s824_s1, 256, %s31_s16, [#allocation6], %s648_s27, %s648_s27, %s649_s28  }
  0x15   :  { %s550_s7 = scalar_lea.hbm %s823_s0, 256 }
  0x16   :  { %p551_p8 = scmp.ne.s32.totalorder %s823_s0, %s550_s7  ;;  %p554_p9 = scmp.lt.u32.totalorder %s550_s7, %s823_s0 }
  0x18   :  { %p556_p10 = pnand %p554_p9, %p551_p8 }
  0x1a   :  { %559 = shalt.err (!%p556_p10)
}
  0x1b   :  { %s560_s12 = scalar_lea.vmem %s687_s18, 256  ;;  %p565_p12 = scmp.lt.s32.totalorder %s687_s18, %s687_s18 }
  0x1c   :  { %p561_p11 = scmp.ne.s32.totalorder %s687_s18, %s560_s12  ;;  %p566_p13 = scmp.lt.s32.totalorder %s560_s12, %s560_s12 }
  0x1e   :  { %p567_p0 = por %p566_p13, %p565_p12 }
  0x20   :  { %p568_p1 = pnand %p567_p0, %p561_p11 }
  0x22   :  { %571 = shalt.err (!%p568_p1)
}
  0x23   :  { %24 = dma.hbm_to_vmem [thread:$0]  %s823_s0, 256, %s687_s18, [#allocation3], %s648_s27, %s648_s27, %s649_s28  }
  0x24   :  { %s650_s14 = smov [#allocation7]   ;;  %s651_s16 = smov [#allocation8]  }
  0x25   :  { %s42_s15 = sshll.u32 %s650_s14, 4  ;;  %s54_s17 = sshll.u32 %s651_s16, 4  ;;  %s43_s15 = int_to_ptr.vmem [resolvable:$true] %s42_s15  ;;  %s724_s17 = int_to_ptr.vmem [resolvable:$true] %s54_s17 }
  0x26   :  { %s572_s21 = scalar_lea.hbm %s825_s2, 2048 }
  0x27   :  { %p573_p2 = scmp.ne.s32.totalorder %s825_s2, %s572_s21  ;;  %p576_p3 = scmp.lt.u32.totalorder %s572_s21, %s825_s2 }
  0x29   :  { %p578_p4 = pnand %p576_p3, %p573_p2 }
  0x2b   :  { %581 = shalt.err (!%p578_p4)
}
  0x2c   :  { %s582_s0 = scalar_lea.vmem %s43_s15, 2048  ;;  %p587_p6 = scmp.lt.s32.totalorder %s43_s15, %s43_s15 }
  0x2d   :  { %p583_p5 = scmp.ne.s32.totalorder %s43_s15, %s582_s0  ;;  %p588_p7 = scmp.lt.s32.totalorder %s582_s0, %s582_s0 }
  0x2f   :  { %p589_p8 = por %p588_p7, %p587_p6 }
  0x31   :  { %p590_p9 = pnand %p589_p8, %p583_p5 }
  0x33   :  { %593 = shalt.err (!%p590_p9)
}
  0x34   :  { %48 = dma.hbm_to_vmem [thread:$0]  %s825_s2, 2048, %s43_s15, [#allocation6], %s648_s27, %s648_s27, %s649_s28  }
  0x35   :  { %s594_s5 = scalar_lea.hbm %s826_s3, 256 }
  0x36   :  { %p595_p10 = scmp.ne.s32.totalorder %s826_s3, %s594_s5  ;;  %p598_p11 = scmp.lt.u32.totalorder %s594_s5, %s826_s3 }
  0x38   :  { %p600_p12 = pnand %p598_p11, %p595_p10 }
  0x3a   :  { %603 = shalt.err (!%p600_p12)
}
  0x3b   :  { %s604_s10 = scalar_lea.vmem %s724_s17, 256  ;;  %p609_p0 = scmp.lt.s32.totalorder %s724_s17, %s724_s17 }
  0x3c   :  { %p605_p13 = scmp.ne.s32.totalorder %s724_s17, %s604_s10  ;;  %p610_p1 = scmp.lt.s32.totalorder %s604_s10, %s604_s10 }
  0x3e   :  { %p611_p2 = por %p610_p1, %p609_p0 }
  0x40   :  { %p612_p3 = pnand %p611_p2, %p605_p13 }
  0x42   :  { %615 = shalt.err (!%p612_p3)
}
  0x43   :  { %60 = dma.hbm_to_vmem [thread:$0]  %s826_s3, 256, %s724_s17, [#allocation9], %s648_s27, %s648_s27, %s649_s28  }
  0x44   :  { %638 = dma.done.wait [#allocation3], 256  }
  0x45   :  { %639 = vsyncadd [#allocation3], 4294967040 }
  0x46   :  { %640 = dma.done.wait [#allocation6], 2304  }
  0x47   :  { %641 = vsyncadd [#allocation6], 4294964992 }
  0x48   :  { %642 = dma.done.wait [#allocation9], 256  }
  0x49   :  { %643 = vsyncadd [#allocation9], 4294967040  ;;  %v73_v0 = vld [vmem:[#allocation2] sm:$0xff]  ;;  %v74_v1 = vld [vmem:[#allocation2 + $0x8] sm:$0xff]  ;;  %v652_v7 = vmov 6   ;;  %v653_v37 = vmov 4   ;;  %v202_v57 = vlaneseq }
  0x4a   :  { %75 = vmax.xlane.f32.xlu0 %v73_v0  ;;  %v95_v2 = vld [vmem:[#allocation7] sm:$0xff]  ;;  %v96_v3 = vld [vmem:[#allocation7 + $0x8] sm:$0xff]  ;;  %v97_v4 = vld [vmem:[#allocation7 + $0x10] sm:$0xff]  ;;  %499 = vset.pattern.permute.xlu1 %v652_v7  ;;  %v654_v38 = vmov 8   ;;  %v655_v39 = vmov 7   ;;  %v656_v40 = vmov 1  }
  0x4b   :  { %v450_v5 = vpack.c.bf16 %v96_v3, %v95_v2  ;;  %v98_v6 = vld [vmem:[#allocation7 + $0x18] sm:$0xff]  ;;  %498 = vset.pattern.permute.xlu0 %v652_v7  ;;  %v99_v9 = vld [vmem:[#allocation7 + $0x20] sm:$0xff]  ;;  %v100_v10 = vld [vmem:[#allocation7 + $0x28] sm:$0xff]  ;;  %v657_v41 = vmov 2   ;;  %v658_v42 = vmov 5   ;;  %v659_v43 = vmov 0  }
  0x4c   :  { %v454_v8 = vpack.c.bf16 %v98_v6, %v97_v4  ;;  %v458_v11 = vpack.c.bf16 %v100_v10, %v99_v9  ;;  %v101_v12 = vld [vmem:[#allocation7 + $0x30] sm:$0xff]  ;;  %v102_v13 = vld [vmem:[#allocation7 + $0x38] sm:$0xff]  ;;  %v103_v23 = vld [vmem:[#allocation7 + $0x40] sm:$0xff]  ;;  %v660_v44 = vmov 3   ;;  %v777_v59 = vshrl.u32 %v202_v57, 7  ;;  %s661_s3 = smov [#allocation10]  }
  0x4d   :  { %451 = vmatprep.subr.bf16.mxu0 %v450_v5  ;;  %v462_v14 = vpack.c.bf16 %v102_v13, %v101_v12  ;;  %v104_v24 = vld [vmem:[#allocation7 + $0x48] sm:$0xff]  ;;  %v188_v26 = vld [vmem:[#allocation5] sm:$0xff]  ;;  %v106_v28 = vld [vmem:[#allocation7 + $0x58] sm:$0xff]  ;;  %s383_s12 = sshll.u32 %s661_s3, 4  ;;  %s384_s12 = int_to_ptr.vmem [resolvable:$true] %s383_s12 }
  0x4e   :  { %77 = vmax.xlane.f32.xlu0 %v74_v1  ;;  %453 = vmatpush3.bf16.msra.mxu0 %v450_v5  ;;  %v466_v25 = vpack.c.bf16 %v104_v24, %v103_v23  ;;  %v105_v27 = vld [vmem:[#allocation7 + $0x50] sm:$0xff]  ;;  %v189_v29 = vld [vmem:[#allocation5 + $0x8] sm:$0xff]  ;;  %v107_v31 = vld [vmem:[#allocation7 + $0x60] sm:$0xff]  ;;  %v276_v61 = vsub.s32 6, %v777_v59  ;;  %v290_v62 = vsub.s32 4, %v777_v59  ;;  %v308_v63 = vsub.s32 7, %v777_v59  ;;  %p621_p5 = scmp.lt.s32.totalorder %s384_s12, %s384_s12 }
  0x4f   :  { %455 = vmatprep.subr.bf16.mxu0 %v454_v8  ;;  %v470_v30 = vpack.c.bf16 %v106_v28, %v105_v27  ;;  %v108_v32 = vld [vmem:[#allocation7 + $0x68] sm:$0xff]  ;;  %v109_v33 = vld [vmem:[#allocation7 + $0x70] sm:$0xff]  ;;  %v110_v35 = vld [vmem:[#allocation7 + $0x78] sm:$0xff]  ;;  %s616_s1 = scalar_lea.vmem %s384_s12, 256 }
  0x50   :  { %v474_v34 = vpack.c.bf16 %v108_v32, %v107_v31  ;;  %v478_v36 = vpack.c.bf16 %v110_v35, %v109_v33  ;;  %p617_p4 = scmp.ne.s32.totalorder %s384_s12, %s616_s1  ;;  %p622_p6 = scmp.lt.s32.totalorder %s616_s1, %s616_s1 }
  0x52   :  { %457 = vmatpush3.bf16.msra.mxu0 %v454_v8  ;;  %p623_p7 = por %p622_p6, %p621_p5 }
  0x53   :  { %459 = vmatprep.subr.bf16.mxu0 %v458_v11 }
  0x54   :  { %p624_p8 = pnand %p623_p7, %p617_p4 }
  0x56   :  { %461 = vmatpush3.bf16.msra.mxu0 %v458_v11 }
  0x57   :  { %463 = vmatprep.subr.bf16.mxu0 %v462_v14 }
  0x5a   :  { %465 = vmatpush3.bf16.msra.mxu0 %v462_v14 }
  0x5b   :  { %467 = vmatprep.subr.bf16.mxu0 %v466_v25 }
  0x5e   :  { %469 = vmatpush3.bf16.msra.mxu0 %v466_v25 }
  0x5f   :  { %471 = vmatprep.subr.bf16.mxu0 %v470_v30 }
  0x62   :  { %473 = vmatpush3.bf16.msra.mxu0 %v470_v30  ;;  %v220_v30 = vsub.s32 1, %v777_v59 }
  0x63   :  { %475 = vmatprep.subr.bf16.mxu0 %v474_v34 }
  0x64   :  { %267 = vperm.xlu0 %498, %v188_v26  }
  0x66   :  { %477 = vmatpush3.bf16.msra.mxu0 %v474_v34 }
  0x67   :  { %479 = vmatprep.subr.bf16.mxu0 %v478_v36 }
  0x68   :  { %504 = vset.pattern.permute.xlu0 %v654_v38 }
  0x69   :  { %337 = vperm.xlu0 %504, %v189_v29  }
  0x6a   :  { %481 = vmatpush3.bf16.msra.mxu0 %v478_v36 }
  0x6d   :  { %506 = vset.pattern.permute.xlu0 %v656_v40 }
  0x6e   :  { %211 = vperm.xlu0 %506, %v188_v26  }
  0x72   :  { %509 = vset.pattern.permute.xlu0 %v657_v41 }
  0x73   :  { %233 = vperm.xlu0 %509, %v189_v29  }
  0x77   :  { %511 = vset.pattern.permute.xlu0 %v654_v38 }
  0xd7   :  { %v76_v15 = vpop.xlane.xlu0 %75 }
  0xd8   :  { %v79_v16 = vsub.f32 %v73_v0, %v76_v15  ;;  %v322_v0 = vsub.s32 5, %v777_v59 }
  0xda   :  { %v81_v17 = vmul.f32 1.442695, %v79_v16 }
  0xdb   :  { %v78_v18 = vpop.xlane.xlu0 %77 }
  0xdc   :  { %512 = vpow2.f32 %v81_v17  ;;  %v80_v19 = vsub.f32 %v74_v1, %v78_v18  ;;  %v783_v1 = vld [vmem:[#allocation8] sm:$0xff] }
  0xdd   :  { %v277_v3 = vrot.slane %v783_v1, %v276_v61  ;;  %v291_v4 = vrot.slane %v783_v1, %v290_v62  ;;  %v309_v5 = vrot.slane %v783_v1, %v308_v63  ;;  %v323_v6 = vrot.slane %v783_v1, %v322_v0 }
  0xde   :  { %v83_v20 = vmul.f32 1.442695, %v80_v19  ;;  %v204_v19 = vsub.s32 0, %v777_v59  ;;  %v256_v61 = vsub.s32 3, %v777_v59 }
  0xe0   :  { %514 = vpow2.f32 %v83_v20  ;;  %v205_v33 = vrot.slane %v783_v1, %v204_v19  ;;  %v257_v0 = vrot.slane %v783_v1, %v256_v61 }
  0xe3   :  { %v268_v11 = vpop.permute.xlu0 %267 }
  0xe4   :  { %v278_v16 = vmin.f32 %v268_v11, %v277_v3 }
  0xe6   :  { %v761_v21 = vpop.eup %512 }
  0xe7   :  { %85 = vadd.xlane.f32.xlu1 %v761_v21 }
  0xea   :  { %v764_v22 = vpop.eup %514 }
  0xeb   :  { %87 = vadd.xlane.f32.xlu1 %v764_v22 }
  0xfc   :  { %271 = vperm.xlu1 %499, %v189_v29  }
 0x100   :  { %500 = vset.pattern.permute.xlu1 %v653_v37  ;;  %v221_v37 = vrot.slane %v783_v1, %v220_v30 }
 0x101   :  { %281 = vperm.xlu1 %500, %v188_v26  }
 0x105   :  { %285 = vperm.xlu1 %500, %v189_v29  }
 0x109   :  { %501 = vset.pattern.permute.xlu1 %v655_v39 }
 0x10a   :  { %299 = vperm.xlu1 %501, %v188_v26  }
 0x10e   :  { %303 = vperm.xlu1 %501, %v189_v29  }
 0x112   :  { %502 = vset.pattern.permute.xlu1 %v658_v42 }
 0x113   :  { %313 = vperm.xlu1 %502, %v188_v26  }
 0x117   :  { %317 = vperm.xlu1 %502, %v189_v29  }
 0x11b   :  { %503 = vset.pattern.permute.xlu1 %v654_v38  ;;  %v238_v38 = vsub.s32 2, %v777_v59 }
 0x11c   :  { %333 = vperm.xlu1 %503, %v188_v26  }
 0x120   :  { %505 = vset.pattern.permute.xlu1 %v659_v43 }
 0x121   :  { %194 = vperm.xlu1 %505, %v188_v26  }
 0x125   :  { %199 = vperm.xlu1 %505, %v189_v29  }
 0x129   :  { %507 = vset.pattern.permute.xlu1 %v656_v40 }
 0x12a   :  { %215 = vperm.xlu1 %507, %v189_v29  }
 0x12e   :  { %508 = vset.pattern.permute.xlu1 %v657_v41 }
 0x12f   :  { %229 = vperm.xlu1 %508, %v188_v26  }
 0x133   :  { %510 = vset.pattern.permute.xlu1 %v660_v44 }
 0x134   :  { %247 = vperm.xlu1 %510, %v188_v26  }
 0x138   :  { %251 = vperm.xlu1 %510, %v189_v29   ;;  %v338_v29 = vpop.permute.xlu0 %337 }
 0x13c   :  { %v212_v43 = vpop.permute.xlu0 %211 }
 0x140   :  { %v234_v63 = vpop.permute.xlu0 %233 }
 0x174   :  { %v86_v45 = vpop.xlane.xlu1 %85 }
 0x175   :  { %516 = vrcp.f32 %v86_v45 }
 0x178   :  { %v88_v46 = vpop.xlane.xlu1 %87 }
 0x179   :  { %518 = vrcp.f32 %v88_v46 }
 0x17c   :  { %v769_v51 = vpop.permute.xlu1 %271 }
 0x17d   :  { %v279_v7 = vmin.f32 %v769_v51, %v277_v3  ;;  %v357_v39 = vmax.f32 %v769_v51, %v277_v3 }
 0x17f   :  { %v517_v47 = vpop.eup %516 }
 0x180   :  { %v93_v48 = vmul.f32 %v517_v47, %v761_v21  ;;  %v771_v52 = vpop.permute.xlu1 %281  ;;  %v356_v47 = vmax.f32 %v268_v11, %v277_v3 }
 0x181   :  { %v292_v13 = vmax.f32 %v771_v52, %v291_v4  ;;  %v358_v44 = vmin.f32 %v771_v52, %v291_v4 }
 0x182   :  { %447 = vmatprep.mubr.f32.mxu0 %v93_v48 }
 0x183   :  { %v519_v49 = vpop.eup %518  ;;  %v294_v21 = vsub.f32 %v278_v16, %v292_v13 }
 0x184   :  { %v94_v50 = vmul.f32 %v519_v49, %v764_v22  ;;  %v286_v53 = vpop.permute.xlu1 %285  ;;  %v191_v22 = vld [vmem:[#allocation8 + $0x8] sm:$0xff] }
 0x185   :  { %v293_v8 = vmax.f32 %v286_v53, %v291_v4  ;;  %v343_v26 = vrot.slane %v191_v22, %v204_v19  ;;  %v296_v28 = vmax.f32 %v294_v21, 0.0  ;;  %v359_v40 = vmin.f32 %v286_v53, %v291_v4 }
 0x186   :  { %448 = vmatmul.mubr.f32.vlgmr.msra.gmra.mrb[0].mxu0 %v94_v50 }
 0x187   :  { %v295_v17 = vsub.f32 %v279_v7, %v293_v8  ;;  %v345_v32 = vadd.f32 %v343_v26, %v338_v29  ;;  %v361_v50 = vsub.f32 %v357_v39, %v359_v40 }
 0x189   :  { %v773_v54 = vpop.permute.xlu1 %299  ;;  %v297_v24 = vmax.f32 %v295_v17, 0.0 }
 0x18a   :  { %v310_v14 = vmin.f32 %v773_v54, %v309_v5  ;;  %v362_v45 = vmax.f32 %v773_v54, %v309_v5  ;;  %v222_v54 = vsub.f32 %v212_v43, %v221_v37 }
 0x18c   :  { %v224_v8 = vand.u32 2147483647, %v222_v54 }
 0x18d   :  { %v304_v55 = vpop.permute.xlu1 %303 }
 0x18e   :  { %v311_v9 = vmin.f32 %v304_v55, %v309_v5  ;;  %v363_v41 = vmax.f32 %v304_v55, %v309_v5  ;;  %v360_v55 = vsub.f32 %v356_v47, %v358_v44 }
 0x192   :  { %v775_v56 = vpop.permute.xlu1 %313 }
 0x193   :  { %v324_v15 = vmax.f32 %v775_v56, %v323_v6  ;;  %v364_v46 = vmin.f32 %v775_v56, %v323_v6 }
 0x195   :  { %v326_v20 = vsub.f32 %v310_v14, %v324_v15  ;;  %v366_v53 = vsub.f32 %v362_v45, %v364_v46 }
 0x196   :  { %v318_v58 = vpop.permute.xlu1 %317 }
 0x197   :  { %v325_v10 = vmax.f32 %v318_v58, %v323_v6  ;;  %v328_v27 = vmax.f32 %v326_v20, 0.0  ;;  %v365_v42 = vmin.f32 %v318_v58, %v323_v6  ;;  %v368_v3 = vmul.f32 %v366_v53, %v360_v55 }
 0x199   :  { %v327_v18 = vsub.f32 %v311_v9, %v325_v10  ;;  %v330_v35 = vmul.f32 %v328_v27, %v296_v28  ;;  %v367_v57 = vsub.f32 %v363_v41, %v365_v42 }
 0x19b   :  { %v334_v60 = vpop.permute.xlu1 %333  ;;  %v329_v25 = vmax.f32 %v327_v18, 0.0  ;;  %v369_v56 = vmul.f32 %v367_v57, %v361_v50 }
 0x19c   :  { %v344_v36 = vadd.f32 %v343_v26, %v334_v60  ;;  %v239_v60 = vrot.slane %v783_v1, %v238_v38 }
 0x19d   :  { %v331_v31 = vmul.f32 %v329_v25, %v297_v24 }
 0x19e   :  { %v346_v49 = vsub.f32 %v344_v36, %v330_v35  ;;  %v241_v6 = vsub.f32 %v234_v63, %v239_v60 }
 0x19f   :  { %v347_v48 = vsub.f32 %v345_v32, %v331_v31 }
 0x1a0   :  { %v785_v2 = vpop.permute.xlu1 %194  ;;  %v243_v11 = vand.u32 2147483647, %v241_v6 }
 0x1a1   :  { %520 = vrcp.f32 %v347_v48  ;;  %v206_v52 = vsub.f32 %v785_v2, %v205_v33 }
 0x1a2   :  { %522 = vrcp.f32 %v346_v49 }
 0x1a3   :  { %v208_v7 = vand.u32 2147483647, %v206_v52  ;;  %524 = vrcp.f32 %v369_v56 }
 0x1a4   :  { %v200_v12 = vpop.permute.xlu1 %199  ;;  %526 = vrcp.f32 %v368_v3 }
 0x1a5   :  { %v207_v58 = vsub.f32 %v200_v12, %v205_v33  ;;  %v226_v13 = vadd.f32 %v224_v8, %v208_v7 }
 0x1a7   :  { %v209_v4 = vand.u32 2147483647, %v207_v58 }
 0x1a9   :  { %v216_v23 = vpop.permute.xlu1 %215 }
 0x1aa   :  { %v223_v62 = vsub.f32 %v216_v23, %v221_v37 }
 0x1ab   :  { %v521_v15 = vpop.eup %520 }
 0x1ac   :  { %v225_v5 = vand.u32 2147483647, %v223_v62  ;;  %v523_v16 = vpop.eup %522  ;;  %v351_v20 = vmul.f32 %v521_v15, %v331_v31 }
 0x1ad   :  { %v350_v22 = vmul.f32 %v523_v16, %v330_v35  ;;  %v525_v26 = vpop.eup %524 }
 0x1ae   :  { %v230_v34 = vpop.permute.xlu1 %229  ;;  %v227_v10 = vadd.f32 %v225_v5, %v209_v4  ;;  %v527_v29 = vpop.eup %526  ;;  %v353_v32 = vsub.f32 1.0, %v351_v20  ;;  %v373_v36 = vmul.f32 %v525_v26, %v347_v48 }
 0x1af   :  { %v240_v59 = vsub.f32 %v230_v34, %v239_v60  ;;  %v352_v34 = vsub.f32 1.0, %v350_v22  ;;  %v372_v38 = vmul.f32 %v527_v29, %v346_v49 }
 0x1b0   :  { %v245_v17 = vadd.f32 %v243_v11, %v227_v10 }
 0x1b1   :  { %v242_v2 = vand.u32 2147483647, %v240_v59 }
 0x1b3   :  { %v248_v51 = vpop.permute.xlu1 %247  ;;  %v244_v18 = vadd.f32 %v242_v2, %v226_v13 }
 0x1b4   :  { %v258_v14 = vsub.f32 %v248_v51, %v257_v0 }
 0x1b6   :  { %v260_v19 = vand.u32 2147483647, %v258_v14 }
 0x1b7   :  { %v252_v9 = vpop.permute.xlu1 %251 }
 0x1b8   :  { %v259_v12 = vsub.f32 %v252_v9, %v257_v0  ;;  %v262_v27 = vadd.f32 %v260_v19, %v244_v18 }
 0x1ba   :  { %v261_v1 = vand.u32 2147483647, %v259_v12 }
 0x1bc   :  { %v263_v23 = vadd.f32 %v261_v1, %v245_v17 }
 0x259   :  { %v449_v21 = vpop.f32.mrb[0].mxu0 }
 0x25a   :  { %v187_v24 = vmul.f32 -1.0, %v449_v21  ;;  %v177_v25 = vpop.f32.mrb[1].mxu0 }
 0x25b   :  { %v186_v28 = vmul.f32 -1.0, %v177_v25 }
 0x25c   :  { %v265_v30 = vadd.f32 %v263_v23, %v187_v24 }
 0x25d   :  { %v264_v33 = vadd.f32 %v262_v27, %v186_v28 }
 0x25e   :  { %v355_v37 = vadd.f32 %v353_v32, %v265_v30 }
 0x25f   :  { %v354_v39 = vadd.f32 %v352_v34, %v264_v33 }
 0x260   :  { %v375_v31 = vsub.f32 %v355_v37, %v373_v36 }
 0x261   :  { %v374_v40 = vsub.f32 %v354_v39, %v372_v38 }
 0x262   :  { %377 = vst [vmem:[#allocation10 + $0x8] sm:$0xff] %v375_v31 }
 0x263   :  { %376 = vst [vmem:[#allocation10] sm:$0xff] %v374_v40 }
 0x264   :  { %627 = shalt.err (!%p624_p8)
}
 0x265   :  { %s628_s15 = scalar_lea.hbm %s827_s4, 256 }
 0x266   :  { %p629_p9 = scmp.ne.s32.totalorder %s827_s4, %s628_s15  ;;  %p632_p10 = scmp.lt.u32.totalorder %s628_s15, %s827_s4 }
 0x268   :  { %p634_p11 = pnand %p632_p10, %p629_p9 }
 0x26a   :  { %637 = shalt.err (!%p634_p11)
}
 0x26b   :  { %389 = dma.vmem_to_hbm [thread:$0]  %s384_s12, 256, %s827_s4, [#allocation4], %s648_s27, %s648_s27, %s649_s28  }
 0x26c   :  { %644 = dma.done.wait [#allocation4], 256  }
 0x26d   :  { %645 = vsyncadd [#allocation4], 4294967040 }
 0x26e   :  { %393 = vsyncpa [#allocation3], 1 }
 0x26f   :  { %394 = vsyncpa [#allocation6], 1 }
 0x270   :  { %395 = vsyncpa [#allocation9], 1 }
 0x271   :  { %396 = vsyncpa [#allocation4], 1 }

</bundles_post_ra>
